<compile_context>
chip_gen: v7x
topology: tpu7x:2x2x1
jax: 0.10.0
libtpu: 0.0.40
codegen_flags: <defaults>
</compile_context>

<pallas_src>
import jax
import jax.numpy as jnp
from jax.experimental import pallas as pl
from jax.experimental.pallas import tpu as pltpu


def fcn1_forward(x, params):
    """Pallas implementation of FCN_1.forward(input, target, is_training=False)."""
    w1, b1, w2, b2, w3, b3 = params
    T, D_full, H = w1.shape
    B, D_comb = x.shape
    out_dim = w3.shape[2]

    # ---- host-side layout prep (pure repack, no math) ----------------------
    # Split W1's rows into the [x | hidden | output] blocks of the concatenated
    # next_cell_input so the kernel never materializes the concat.  The x-block
    # is flattened to (D_comb, T*H) so the step-invariant x-term is one matmul.
    w1x = jnp.transpose(w1[:, :D_comb, :], (1, 0, 2)).reshape(D_comb, T * H)
    w1h = w1[:, D_comb:D_comb + H, :]            # (T, H, H)        (step-0 slice unused/zero)
    w1o = w1[:, D_comb + H:, :]                  # (T, out_dim, H)  (step-0 slice unused/zero)
    b_all = jnp.concatenate([b1, b2, b3], axis=-1)   # (T, 1, 2H + out_dim)

    def kernel(x_ref, w1x_ref, w1h_ref, w1o_ref, w2_ref, w3_ref, b_ref, out_ref):
        x_v = x_ref[...]                                             # (B, D_comb)
        # x-term of every step's first layer, hoisted off the recurrence path:
        # a single lane-dense MXU matmul -> (B, T*H).
        xw1 = jnp.dot(x_v, w1x_ref[...], preferred_element_type=jnp.float32)

        h2 = None
        out = None
        for i in range(T):          # T is small & static -> fully unrolled
            b_i = b_ref[i]                                           # (1, 2H+out_dim)
            pre = xw1[:, i * H:(i + 1) * H] + b_i[:, 0:H]            # (B, H)
            if i > 0:
                # Recurrent terms, chained accumulation into one f32 value
                # (maps onto MRB in-place accumulate on v7x; neutral elsewhere).
                pre = pre + jnp.dot(h2, w1h_ref[i],
                                    preferred_element_type=jnp.float32)
                pre = pre + jnp.dot(out, w1o_ref[i],
                                    preferred_element_type=jnp.float32)
            h1 = jnp.maximum(pre, 0.0)
            h2 = jnp.maximum(
                jnp.dot(h1, w2_ref[i], preferred_element_type=jnp.float32)
                + b_i[:, H:2 * H], 0.0)
            out = (jnp.dot(h2, w3_ref[i], preferred_element_type=jnp.float32)
                   + b_i[:, 2 * H:2 * H + out_dim])
            out_ref[i] = out.astype(out_ref.dtype)

    def vmem_spec():
        return pl.BlockSpec(memory_space=pltpu.MemorySpace.VMEM)

    return pl.pallas_call(
        kernel,
        out_shape=jax.ShapeDtypeStruct((T, B, out_dim), jnp.float32),
        in_specs=[vmem_spec() for _ in range(7)],
        out_specs=vmem_spec(),
    )(x, w1x, w1h, w1o, w2, w3, b_all)


def fcn1_reference(x, params):
    """Pure-JAX reference mirroring the PyTorch forward (is_training=False)."""
    w1, b1, w2, b2, w3, b3 = params
    T = w1.shape[0]
    B, D_comb = x.shape
    D_full = w1.shape[1]
    cell = jnp.concatenate([x, jnp.zeros((B, D_full - D_comb), x.dtype)], axis=1)
    outs = []
    for i in range(T):
        h1 = jax.nn.relu(cell @ w1[i] + b1[i, 0])
        h2 = jax.nn.relu(h1 @ w2[i] + b2[i, 0])
        out = h2 @ w3[i] + b3[i, 0]
        outs.append(out)
        cell = jnp.concatenate([x, h2, out], axis=1)
    return jnp.stack(outs, axis=0)


def make_params(key, input_dim, hidden_dim, output_dim, in_seq_length, out_seq_length):
    """Deterministic synthetic parameters with the shapes FCN_1.__init__ implies."""
    D_comb = input_dim * in_seq_length
    D_full = D_comb + hidden_dim + output_dim
    T = out_seq_length
    ks = jax.random.split(key, 6)
    scale = 0.1
    w1 = scale * jax.random.normal(ks[0], (T, D_full, hidden_dim), jnp.float32)
    # Step 0's hidden_layer1 only sees D_comb features: zero the extra rows so
    # the uniform (T, D_full, H) layout is exactly equivalent to the PyTorch
    # step-0 Linear (the kernel skips these rows entirely at i == 0 anyway).
    w1 = w1.at[0, D_comb:, :].set(0.0)
    b1 = scale * jax.random.normal(ks[1], (T, 1, hidden_dim), jnp.float32)
    w2 = scale * jax.random.normal(ks[2], (T, hidden_dim, hidden_dim), jnp.float32)
    b2 = scale * jax.random.normal(ks[3], (T, 1, hidden_dim), jnp.float32)
    w3 = scale * jax.random.normal(ks[4], (T, hidden_dim, output_dim), jnp.float32)
    b3 = scale * jax.random.normal(ks[5], (T, 1, output_dim), jnp.float32)
    return (w1, b1, w2, b2, w3, b3)


if __name__ == "__main__":
    # Small shapes consistent with the module:
    input_dim, hidden_dim, output_dim = 4, 32, 4
    in_seq_length, out_seq_length = 8, 3
    batch = 2
    D_comb = input_dim * in_seq_length

    key = jax.random.PRNGKey(0)
    kx, kt, kp = jax.random.split(key, 3)
    x = jax.random.normal(kx, (batch, D_comb), jnp.float32)
    # target is accepted but unused for is_training=False (matches PyTorch path).
    target = jax.random.normal(kt, (out_seq_length, batch, output_dim), jnp.float32)
    params = make_params(kp, input_dim, hidden_dim, output_dim,
                         in_seq_length, out_seq_length)

    out = fcn1_forward(x, params)
    out = jax.block_until_ready(out)

    ref = fcn1_reference(x, params)
    assert out.shape == (out_seq_length, batch, output_dim)
    assert jnp.allclose(out, ref, atol=1e-5, rtol=1e-5), "mismatch vs reference"

    print("KERNEL_OK")
</pallas_src>

<mosaic_0001>
module attributes {stable_mosaic.version = 11 : i64} {
  func.func @kernel(%arg0: memref<2x32xf32, #tpu.memory_space<vmem>>, %arg1: memref<32x96xf32, #tpu.memory_space<vmem>>, %arg2: memref<3x32x32xf32, #tpu.memory_space<vmem>>, %arg3: memref<3x4x32xf32, #tpu.memory_space<vmem>>, %arg4: memref<3x32x32xf32, #tpu.memory_space<vmem>>, %arg5: memref<3x32x4xf32, #tpu.memory_space<vmem>>, %arg6: memref<3x1x68xf32, #tpu.memory_space<vmem>>, %arg7: memref<3x2x4xf32, #tpu.memory_space<vmem>>) attributes {dimension_semantics = [], scalar_prefetch = 0 : i64, scratch_operands = 0 : i64, tpu.core_type = #tpu.core_type<tc>} {
    %c0 = arith.constant 0 : index
    %c0_0 = arith.constant 0 : index
    %0 = vector.load %arg0[%c0, %c0_0] : memref<2x32xf32, #tpu.memory_space<vmem>>, vector<2x32xf32>
    %c0_1 = arith.constant 0 : index
    %c0_2 = arith.constant 0 : index
    %1 = vector.load %arg1[%c0_1, %c0_2] : memref<32x96xf32, #tpu.memory_space<vmem>>, vector<32x96xf32>
    %cst = arith.constant dense<0.000000e+00> : vector<2x96xf32>
    %2 = tpu.matmul %0, %1, %cst {dimension_numbers = #tpu.dot_dimension_numbers<[1], [0], [0], [1], [0, 0, 1, 1], [], []>} : vector<2x32xf32>, vector<32x96xf32>, vector<2x96xf32> -> vector<2x96xf32>
    %c0_3 = arith.constant 0 : index
    %c0_4 = arith.constant 0 : index
    %c0_5 = arith.constant 0 : index
    %3 = vector.load %arg6[%c0_3, %c0_4, %c0_5] : memref<3x1x68xf32, #tpu.memory_space<vmem>>, vector<1x1x68xf32>
    %4 = vector.shape_cast %3 : vector<1x1x68xf32> to vector<1x68xf32>
    %5 = vector.extract_strided_slice %2 {offsets = [0, 0], sizes = [2, 32], strides = [1, 1]} : vector<2x96xf32> to vector<2x32xf32>
    %6 = vector.extract_strided_slice %4 {offsets = [0, 0], sizes = [1, 32], strides = [1, 1]} : vector<1x68xf32> to vector<1x32xf32>
    %7 = vector.broadcast %6 : vector<1x32xf32> to vector<2x32xf32>
    %8 = arith.addf %5, %7 : vector<2x32xf32>
    %cst_6 = arith.constant 0.000000e+00 : f32
    %9 = vector.broadcast %cst_6 : f32 to vector<2x32xf32>
    %10 = arith.maximumf %8, %9 : vector<2x32xf32>
    %c0_7 = arith.constant 0 : index
    %c0_8 = arith.constant 0 : index
    %c0_9 = arith.constant 0 : index
    %11 = vector.load %arg4[%c0_7, %c0_8, %c0_9] : memref<3x32x32xf32, #tpu.memory_space<vmem>>, vector<1x32x32xf32>
    %12 = vector.shape_cast %11 : vector<1x32x32xf32> to vector<32x32xf32>
    %cst_10 = arith.constant dense<0.000000e+00> : vector<2x32xf32>
    %13 = tpu.matmul %10, %12, %cst_10 {dimension_numbers = #tpu.dot_dimension_numbers<[1], [0], [0], [1], [0, 0, 1, 1], [], []>} : vector<2x32xf32>, vector<32x32xf32>, vector<2x32xf32> -> vector<2x32xf32>
    %14 = vector.extract_strided_slice %4 {offsets = [0, 32], sizes = [1, 32], strides = [1, 1]} : vector<1x68xf32> to vector<1x32xf32>
    %15 = vector.broadcast %14 : vector<1x32xf32> to vector<2x32xf32>
    %16 = arith.addf %13, %15 : vector<2x32xf32>
    %cst_11 = arith.constant 0.000000e+00 : f32
    %17 = vector.broadcast %cst_11 : f32 to vector<2x32xf32>
    %18 = arith.maximumf %16, %17 : vector<2x32xf32>
    %c0_12 = arith.constant 0 : index
    %c0_13 = arith.constant 0 : index
    %c0_14 = arith.constant 0 : index
    %19 = vector.load %arg5[%c0_12, %c0_13, %c0_14] : memref<3x32x4xf32, #tpu.memory_space<vmem>>, vector<1x32x4xf32>
    %20 = vector.shape_cast %19 : vector<1x32x4xf32> to vector<32x4xf32>
    %cst_15 = arith.constant dense<0.000000e+00> : vector<2x4xf32>
    %21 = tpu.matmul %18, %20, %cst_15 {dimension_numbers = #tpu.dot_dimension_numbers<[1], [0], [0], [1], [0, 0, 1, 1], [], []>} : vector<2x32xf32>, vector<32x4xf32>, vector<2x4xf32> -> vector<2x4xf32>
    %22 = vector.extract_strided_slice %4 {offsets = [0, 64], sizes = [1, 4], strides = [1, 1]} : vector<1x68xf32> to vector<1x4xf32>
    %23 = vector.broadcast %22 : vector<1x4xf32> to vector<2x4xf32>
    %24 = arith.addf %21, %23 : vector<2x4xf32>
    %c0_16 = arith.constant 0 : index
    %c0_17 = arith.constant 0 : index
    %c0_18 = arith.constant 0 : index
    %25 = vector.load %arg7[%c0_16, %c0_17, %c0_18] : memref<3x2x4xf32, #tpu.memory_space<vmem>>, vector<1x2x4xf32>
    %26 = vector.shape_cast %25 : vector<1x2x4xf32> to vector<2x4xf32>
    %27 = vector.shape_cast %24 : vector<2x4xf32> to vector<1x2x4xf32>
    tpu.vector_store %arg7[%c0_16, %c0_17, %c0_18], %27 {strides = array<i32>} : memref<3x2x4xf32, #tpu.memory_space<vmem>>, vector<1x2x4xf32>,
    %c1 = arith.constant 1 : index
    %c0_19 = arith.constant 0 : index
    %c0_20 = arith.constant 0 : index
    %28 = vector.load %arg6[%c1, %c0_19, %c0_20] : memref<3x1x68xf32, #tpu.memory_space<vmem>>, vector<1x1x68xf32>
    %29 = vector.shape_cast %28 : vector<1x1x68xf32> to vector<1x68xf32>
    %30 = vector.extract_strided_slice %2 {offsets = [0, 32], sizes = [2, 32], strides = [1, 1]} : vector<2x96xf32> to vector<2x32xf32>
    %31 = vector.extract_strided_slice %29 {offsets = [0, 0], sizes = [1, 32], strides = [1, 1]} : vector<1x68xf32> to vector<1x32xf32>
    %32 = vector.broadcast %31 : vector<1x32xf32> to vector<2x32xf32>
    %33 = arith.addf %30, %32 : vector<2x32xf32>
    %c1_21 = arith.constant 1 : index
    %c0_22 = arith.constant 0 : index
    %c0_23 = arith.constant 0 : index
    %34 = vector.load %arg2[%c1_21, %c0_22, %c0_23] : memref<3x32x32xf32, #tpu.memory_space<vmem>>, vector<1x32x32xf32>
    %35 = vector.shape_cast %34 : vector<1x32x32xf32> to vector<32x32xf32>
    %cst_24 = arith.constant dense<0.000000e+00> : vector<2x32xf32>
    %36 = tpu.matmul %18, %35, %cst_24 {dimension_numbers = #tpu.dot_dimension_numbers<[1], [0], [0], [1], [0, 0, 1, 1], [], []>} : vector<2x32xf32>, vector<32x32xf32>, vector<2x32xf32> -> vector<2x32xf32>
    %37 = arith.addf %33, %36 : vector<2x32xf32>
    %c1_25 = arith.constant 1 : index
    %c0_26 = arith.constant 0 : index
    %c0_27 = arith.constant 0 : index
    %38 = vector.load %arg3[%c1_25, %c0_26, %c0_27] : memref<3x4x32xf32, #tpu.memory_space<vmem>>, vector<1x4x32xf32>
    %39 = vector.shape_cast %38 : vector<1x4x32xf32> to vector<4x32xf32>
    %cst_28 = arith.constant dense<0.000000e+00> : vector<2x32xf32>
    %40 = tpu.matmul %24, %39, %cst_28 {dimension_numbers = #tpu.dot_dimension_numbers<[1], [0], [0], [1], [0, 0, 1, 1], [], []>} : vector<2x4xf32>, vector<4x32xf32>, vector<2x32xf32> -> vector<2x32xf32>
    %41 = arith.addf %37, %40 : vector<2x32xf32>
    %cst_29 = arith.constant 0.000000e+00 : f32
    %42 = vector.broadcast %cst_29 : f32 to vector<2x32xf32>
    %43 = arith.maximumf %41, %42 : vector<2x32xf32>
    %c1_30 = arith.constant 1 : index
    %c0_31 = arith.constant 0 : index
    %c0_32 = arith.constant 0 : index
    %44 = vector.load %arg4[%c1_30, %c0_31, %c0_32] : memref<3x32x32xf32, #tpu.memory_space<vmem>>, vector<1x32x32xf32>
    %45 = vector.shape_cast %44 : vector<1x32x32xf32> to vector<32x32xf32>
    %cst_33 = arith.constant dense<0.000000e+00> : vector<2x32xf32>
    %46 = tpu.matmul %43, %45, %cst_33 {dimension_numbers = #tpu.dot_dimension_numbers<[1], [0], [0], [1], [0, 0, 1, 1], [], []>} : vector<2x32xf32>, vector<32x32xf32>, vector<2x32xf32> -> vector<2x32xf32>
    %47 = vector.extract_strided_slice %29 {offsets = [0, 32], sizes = [1, 32], strides = [1, 1]} : vector<1x68xf32> to vector<1x32xf32>
    %48 = vector.broadcast %47 : vector<1x32xf32> to vector<2x32xf32>
    %49 = arith.addf %46, %48 : vector<2x32xf32>
    %cst_34 = arith.constant 0.000000e+00 : f32
    %50 = vector.broadcast %cst_34 : f32 to vector<2x32xf32>
    %51 = arith.maximumf %49, %50 : vector<2x32xf32>
    %c1_35 = arith.constant 1 : index
    %c0_36 = arith.constant 0 : index
    %c0_37 = arith.constant 0 : index
    %52 = vector.load %arg5[%c1_35, %c0_36, %c0_37] : memref<3x32x4xf32, #tpu.memory_space<vmem>>, vector<1x32x4xf32>
    %53 = vector.shape_cast %52 : vector<1x32x4xf32> to vector<32x4xf32>
    %cst_38 = arith.constant dense<0.000000e+00> : vector<2x4xf32>
    %54 = tpu.matmul %51, %53, %cst_38 {dimension_numbers = #tpu.dot_dimension_numbers<[1], [0], [0], [1], [0, 0, 1, 1], [], []>} : vector<2x32xf32>, vector<32x4xf32>, vector<2x4xf32> -> vector<2x4xf32>
    %55 = vector.extract_strided_slice %29 {offsets = [0, 64], sizes = [1, 4], strides = [1, 1]} : vector<1x68xf32> to vector<1x4xf32>
    %56 = vector.broadcast %55 : vector<1x4xf32> to vector<2x4xf32>
    %57 = arith.addf %54, %56 : vector<2x4xf32>
    %c1_39 = arith.constant 1 : index
    %c0_40 = arith.constant 0 : index
    %c0_41 = arith.constant 0 : index
    %58 = vector.load %arg7[%c1_39, %c0_40, %c0_41] : memref<3x2x4xf32, #tpu.memory_space<vmem>>, vector<1x2x4xf32>
    %59 = vector.shape_cast %58 : vector<1x2x4xf32> to vector<2x4xf32>
    %60 = vector.shape_cast %57 : vector<2x4xf32> to vector<1x2x4xf32>
    tpu.vector_store %arg7[%c1_39, %c0_40, %c0_41], %60 {strides = array<i32>} : memref<3x2x4xf32, #tpu.memory_space<vmem>>, vector<1x2x4xf32>,
    %c2 = arith.constant 2 : index
    %c0_42 = arith.constant 0 : index
    %c0_43 = arith.constant 0 : index
    %61 = vector.load %arg6[%c2, %c0_42, %c0_43] : memref<3x1x68xf32, #tpu.memory_space<vmem>>, vector<1x1x68xf32>
    %62 = vector.shape_cast %61 : vector<1x1x68xf32> to vector<1x68xf32>
    %63 = vector.extract_strided_slice %2 {offsets = [0, 64], sizes = [2, 32], strides = [1, 1]} : vector<2x96xf32> to vector<2x32xf32>
    %64 = vector.extract_strided_slice %62 {offsets = [0, 0], sizes = [1, 32], strides = [1, 1]} : vector<1x68xf32> to vector<1x32xf32>
    %65 = vector.broadcast %64 : vector<1x32xf32> to vector<2x32xf32>
    %66 = arith.addf %63, %65 : vector<2x32xf32>
    %c2_44 = arith.constant 2 : index
    %c0_45 = arith.constant 0 : index
    %c0_46 = arith.constant 0 : index
    %67 = vector.load %arg2[%c2_44, %c0_45, %c0_46] : memref<3x32x32xf32, #tpu.memory_space<vmem>>, vector<1x32x32xf32>
    %68 = vector.shape_cast %67 : vector<1x32x32xf32> to vector<32x32xf32>
    %cst_47 = arith.constant dense<0.000000e+00> : vector<2x32xf32>
    %69 = tpu.matmul %51, %68, %cst_47 {dimension_numbers = #tpu.dot_dimension_numbers<[1], [0], [0], [1], [0, 0, 1, 1], [], []>} : vector<2x32xf32>, vector<32x32xf32>, vector<2x32xf32> -> vector<2x32xf32>
    %70 = arith.addf %66, %69 : vector<2x32xf32>
    %c2_48 = arith.constant 2 : index
    %c0_49 = arith.constant 0 : index
    %c0_50 = arith.constant 0 : index
    %71 = vector.load %arg3[%c2_48, %c0_49, %c0_50] : memref<3x4x32xf32, #tpu.memory_space<vmem>>, vector<1x4x32xf32>
    %72 = vector.shape_cast %71 : vector<1x4x32xf32> to vector<4x32xf32>
    %cst_51 = arith.constant dense<0.000000e+00> : vector<2x32xf32>
    %73 = tpu.matmul %57, %72, %cst_51 {dimension_numbers = #tpu.dot_dimension_numbers<[1], [0], [0], [1], [0, 0, 1, 1], [], []>} : vector<2x4xf32>, vector<4x32xf32>, vector<2x32xf32> -> vector<2x32xf32>
    %74 = arith.addf %70, %73 : vector<2x32xf32>
    %cst_52 = arith.constant 0.000000e+00 : f32
    %75 = vector.broadcast %cst_52 : f32 to vector<2x32xf32>
    %76 = arith.maximumf %74, %75 : vector<2x32xf32>
    %c2_53 = arith.constant 2 : index
    %c0_54 = arith.constant 0 : index
    %c0_55 = arith.constant 0 : index
    %77 = vector.load %arg4[%c2_53, %c0_54, %c0_55] : memref<3x32x32xf32, #tpu.memory_space<vmem>>, vector<1x32x32xf32>
    %78 = vector.shape_cast %77 : vector<1x32x32xf32> to vector<32x32xf32>
    %cst_56 = arith.constant dense<0.000000e+00> : vector<2x32xf32>
    %79 = tpu.matmul %76, %78, %cst_56 {dimension_numbers = #tpu.dot_dimension_numbers<[1], [0], [0], [1], [0, 0, 1, 1], [], []>} : vector<2x32xf32>, vector<32x32xf32>, vector<2x32xf32> -> vector<2x32xf32>
    %80 = vector.extract_strided_slice %62 {offsets = [0, 32], sizes = [1, 32], strides = [1, 1]} : vector<1x68xf32> to vector<1x32xf32>
    %81 = vector.broadcast %80 : vector<1x32xf32> to vector<2x32xf32>
    %82 = arith.addf %79, %81 : vector<2x32xf32>
    %cst_57 = arith.constant 0.000000e+00 : f32
    %83 = vector.broadcast %cst_57 : f32 to vector<2x32xf32>
    %84 = arith.maximumf %82, %83 : vector<2x32xf32>
    %c2_58 = arith.constant 2 : index
    %c0_59 = arith.constant 0 : index
    %c0_60 = arith.constant 0 : index
    %85 = vector.load %arg5[%c2_58, %c0_59, %c0_60] : memref<3x32x4xf32, #tpu.memory_space<vmem>>, vector<1x32x4xf32>
    %86 = vector.shape_cast %85 : vector<1x32x4xf32> to vector<32x4xf32>
    %cst_61 = arith.constant dense<0.000000e+00> : vector<2x4xf32>
    %87 = tpu.matmul %84, %86, %cst_61 {dimension_numbers = #tpu.dot_dimension_numbers<[1], [0], [0], [1], [0, 0, 1, 1], [], []>} : vector<2x32xf32>, vector<32x4xf32>, vector<2x4xf32> -> vector<2x4xf32>
    %88 = vector.extract_strided_slice %62 {offsets = [0, 64], sizes = [1, 4], strides = [1, 1]} : vector<1x68xf32> to vector<1x4xf32>
    %89 = vector.broadcast %88 : vector<1x4xf32> to vector<2x4xf32>
    %90 = arith.addf %87, %89 : vector<2x4xf32>
    %c2_62 = arith.constant 2 : index
    %c0_63 = arith.constant 0 : index
    %c0_64 = arith.constant 0 : index
    %91 = vector.load %arg7[%c2_62, %c0_63, %c0_64] : memref<3x2x4xf32, #tpu.memory_space<vmem>>, vector<1x2x4xf32>
    %92 = vector.shape_cast %91 : vector<1x2x4xf32> to vector<2x4xf32>
    %93 = vector.shape_cast %90 : vector<2x4xf32> to vector<1x2x4xf32>
    tpu.vector_store %arg7[%c2_62, %c0_63, %c0_64], %93 {strides = array<i32>} : memref<3x2x4xf32, #tpu.memory_space<vmem>>, vector<1x2x4xf32>,
    return
  }
}

</mosaic_0001>

<bundles_post_ra>
// kernel: tpu_custom_call.1
= control target key start
LH: loop header
LB: loop body
LE: loop exit
PB: predicated region body
PF: predicated region fallthrough
CT: control target
= control target key end

     0   :  { %12 = vsyncpa [#allocation3], 0  ;;  %s1592_s0 = inlined_call_operand.vmem [shape: f32[2,32], index: 0, kind: input, shape index: {}]   ;;  %s1593_s1 = inlined_call_operand.hbm [shape: f32[32,96], index: 1, kind: input, shape index: {}]   ;;  %s1594_s2 = inlined_call_operand.vmem [shape: f32[3,32,32], index: 2, kind: input, shape index: {}]   ;;  %s1595_s3 = inlined_call_operand.vmem [shape: f32[3,4,32], index: 3, kind: input, shape index: {}]   ;;  %s1596_s4 = inlined_call_operand.hbm [shape: f32[3,32,32], index: 4, kind: input, shape index: {}]   ;;  %s1597_s5 = inlined_call_operand.vmem [shape: f32[3,32,4], index: 5, kind: input, shape index: {}]   ;;  %s1598_s6 = inlined_call_operand.vmem [shape: f32[3,1,68], index: 6, kind: input, shape index: {}]   ;;  %s1599_s7 = inlined_call_operand.hbm [shape: f32[3,2,4], index: 7, kind: output, shape index: {}]  }
   0x1   :  { %13 = vsyncpa [#allocation6], 0 }
   0x2   :  { %14 = vsyncpa [#allocation4], 0  ;;  %s1339_s24 = smov [#allocation2]   ;;  %s1267_s28 = scalar_lea.hbm %s1593_s1, 512 }
   0x3   :  { %s22_s25 = sshll.u32 %s1339_s24, 4  ;;  %p1268_p0 = scmp.ne.s32.totalorder %s1593_s1, %s1267_s28  ;;  %s23_s25 = int_to_ptr.vmem [resolvable:$true] %s22_s25 }
   0x4   :  { %p1271_p1 = scmp.lt.u32.totalorder %s1267_s28, %s1593_s1 }
   0x6   :  { %p1273_p2 = pnand %p1271_p1, %p1268_p0 }
   0x8   :  { %1276 = shalt.err (!%p1273_p2)
}
   0x9   :  { %s1277_s10 = scalar_lea.vmem %s23_s25, 512  ;;  %p1282_p4 = scmp.lt.s32.totalorder %s23_s25, %s23_s25 }
   0xa   :  { %p1278_p3 = scmp.ne.s32.totalorder %s23_s25, %s1277_s10  ;;  %p1283_p5 = scmp.lt.s32.totalorder %s1277_s10, %s1277_s10 }
   0xc   :  { %p1284_p6 = por %p1283_p5, %p1282_p4 }
   0xe   :  { %p1285_p7 = pnand %p1284_p6, %p1278_p3 }
  0x10   :  { %1288 = shalt.err (!%p1285_p7)
}
  0x11   :  { %s1340_s11 = smov 128   ;;  %s1341_s12 = smov 8  }
  0x12   :  { %28 = dma.hbm_to_vmem [thread:$0]  %s1593_s1, 512, %s23_s25, [#allocation3], %s1340_s11, %s1340_s11, %s1341_s12  }
  0x13   :  { %s1342_s15 = smov [#allocation5]   ;;  %s1289_s19 = scalar_lea.hbm %s1596_s4, 1536 }
  0x14   :  { %s38_s16 = sshll.u32 %s1342_s15, 4  ;;  %p1290_p8 = scmp.ne.s32.totalorder %s1596_s4, %s1289_s19  ;;  %s39_s16 = int_to_ptr.vmem [resolvable:$true] %s38_s16 }
  0x15   :  { %p1293_p9 = scmp.lt.u32.totalorder %s1289_s19, %s1596_s4 }
  0x17   :  { %p1295_p10 = pnand %p1293_p9, %p1290_p8 }
  0x19   :  { %1298 = shalt.err (!%p1295_p10)
}
  0x1a   :  { %s1299_s24 = scalar_lea.vmem %s39_s16, 1536  ;;  %p1304_p12 = scmp.lt.s32.totalorder %s39_s16, %s39_s16 }
  0x1b   :  { %p1300_p11 = scmp.ne.s32.totalorder %s39_s16, %s1299_s24  ;;  %p1305_p13 = scmp.lt.s32.totalorder %s1299_s24, %s1299_s24 }
  0x1d   :  { %p1306_p0 = por %p1305_p13, %p1304_p12 }
  0x1f   :  { %p1307_p1 = pnand %p1306_p0, %p1300_p11 }
  0x21   :  { %1310 = shalt.err (!%p1307_p1)
}
  0x22   :  { %44 = dma.hbm_to_vmem [thread:$0]  %s1596_s4, 1536, %s39_s16, [#allocation6], %s1340_s11, %s1340_s11, %s1341_s12  }
  0x23   :  { %1333 = dma.done.wait [#allocation3], 512  }
  0x24   :  { %1334 = vsyncadd [#allocation3], 4294966784 }
  0x25   :  { %1335 = dma.done.wait [#allocation6], 1536  }
  0x26   :  { %1336 = vsyncadd [#allocation6], 4294965760  ;;  %v1343_v0 = vmov 0.0|0.0   ;;  %vm1344_vm0 = vmmov 0   ;;  %v1345_v1 = vmov 0.0   ;;  %v56_v2 = vld [vmem:[#allocation2] sm:$0xff] }
  0x27   :  { %1201 = vmatprep.subr.bf16.mxu0 %v1343_v0  ;;  %1100 = vmatprep.mubr.msk.f32.mxu0 %vm1344_vm0, %v1345_v1  ;;  %v57_v3 = vld [vmem:[#allocation2 + $0x8] sm:$0xff]  ;;  %v58_v4 = vld [vmem:[#allocation2 + $0x10] sm:$0xff]  ;;  %v59_v6 = vld [vmem:[#allocation2 + $0x18] sm:$0xff]  ;;  %s1346_s27 = smov 32   ;;  %vm60_vm1 = vcmask 261120   ;;  %s1347_s12 = smov 96  }
  0x28   :  { %1207 = vmatprep.subr.bf16.mxu1 %v1343_v0  ;;  %1111 = vmatprep.mubr.msk.f32.mxu1 %vm1344_vm0, %v1345_v1  ;;  %v1202_v5 = vpack.c.bf16 %v57_v3, %v56_v2  ;;  %v1424_v7 = vld [vmem:[%s1598_s6 + $0x1] ss:$0 sm:$0xff]  ;;  %v144_v9 = vld [vmem:[#allocation5 + $0x8] sm:$0xff]  ;;  %v1205_v10 = vpack.c.bf16 %v59_v6, %v58_v4  ;;  %v145_v13 = vld [vmem:[#allocation5 + $0x10] sm:$0xff]  ;;  %s1348_s1 = smov 64   ;;  %vm403_vm2 = vcmask 1043456  }
  0x29   :  { %313 = vrot.lane.b32.xlu1 %v1424_v7, %s1346_s27  ;;  %v143_v8 = vld [vmem:[#allocation5] sm:$0xff]  ;;  %v146_v14 = vld [vmem:[#allocation5 + $0x18] sm:$0xff]  ;;  %v225_v18 = vld [vmem:[%s1597_s5 + $0x8] sm:$0xff]  ;;  %vm304_vm3 = vcmask 25600   ;;  %vm399_vm4 = vcmask 31744  }
  0x2a   :  { %1203 = vmatpush3.bf16.msra.mxu0 %v1202_v5  ;;  %v1208_v11 = vpack.c.bf16 %v144_v9, %v143_v8  ;;  %v55_v12 = vld [vmem:[%s1592_s0] sm:$0x3]  ;;  %v1211_v15 = vpack.c.bf16 %v146_v14, %v145_v13  ;;  %v1014_v21 = vld [vmem:[%s1594_s2 + $0x28] sm:$0xff]  ;;  %v226_v27 = vld [vmem:[%s1597_s5 + $0x10] sm:$0xff] }
  0x2b   :  { %1204 = vmatprep.subr.bf16.mxu0 %v1343_v0  ;;  %v1008_v16 = vld [vmem:[%s1598_s6] ss:$0 sm:$0xff]  ;;  %v227_v28 = vld [vmem:[%s1597_s5 + $0x18] sm:$0xff]  ;;  %v1015_v29 = vld [vmem:[%s1594_s2 + $0x30] sm:$0xff] }
  0x2c   :  { %1209 = vmatpush3.bf16.msra.mxu1 %v1208_v11  ;;  %v224_v17 = vld [vmem:[%s1597_s5] sm:$0xff]  ;;  %147 = vrot.lane.b32.xlu0 %v1008_v16, %s1347_s12  ;;  %v1217_v30 = vpack.c.bf16 %v227_v28, %v226_v27  ;;  %v1016_v31 = vld [vmem:[%s1594_s2 + $0x38] sm:$0xff]  ;;  %v485_v46 = vld [vmem:[#allocation5 + $0x28] sm:$0xff] }
  0x2d   :  { %1210 = vmatprep.subr.bf16.mxu1 %v1343_v0  ;;  %v1214_v19 = vpack.c.bf16 %v225_v18, %v224_v17  ;;  %v1013_v20 = vld [vmem:[%s1594_s2 + $0x20] sm:$0xff]  ;;  %v1223_v32 = vpack.c.bf16 %v1016_v31, %v1015_v29  ;;  %v486_v47 = vld [vmem:[#allocation5 + $0x30] sm:$0xff]  ;;  %v487_v49 = vld [vmem:[#allocation5 + $0x38] sm:$0xff] }
  0x2e   :  { %1206 = vmatpush3.bf16.msra.mxu0 %v1205_v10  ;;  %v1220_v25 = vpack.c.bf16 %v1014_v21, %v1013_v20  ;;  %v1018_v38 = vld [vmem:[%s1595_s3 + $0x4] sm:$0xf]  ;;  %v1229_v50 = vpack.c.bf16 %v487_v49, %v486_v47  ;;  %v1501_v53 = vld [vmem:[%s1598_s6 + $0x2] ss:$0 sm:$0xff]  ;;  %v1023_v56 = vld [vmem:[%s1597_s5 + $0x28] sm:$0xff] }
  0x2f   :  { %1213 = vmatprep.subr.bf16.mxu0 %v1343_v0  ;;  %v484_v45 = vld [vmem:[#allocation5 + $0x20] sm:$0xff]  ;;  %v1030_v3 = vld [vmem:[%s1594_s2 + $0x48] sm:$0xff]  ;;  %v1024_v6 = vld [vmem:[%s1597_s5 + $0x30] sm:$0xff] }
  0x30   :  { %1212 = vmatpush3.bf16.msra.mxu1 %v1211_v15  ;;  %228 = vrot.lane.b32.xlu0 %v1008_v16, %s1348_s1  ;;  %v1226_v48 = vpack.c.bf16 %v485_v46, %v484_v45  ;;  %v1022_v55 = vld [vmem:[%s1597_s5 + $0x20] sm:$0xff]  ;;  %v1031_v8 = vld [vmem:[%s1594_s2 + $0x50] sm:$0xff]  ;;  %v1032_v10 = vld [vmem:[%s1594_s2 + $0x58] sm:$0xff] }
  0x31   :  { %1101 = vmatmul.mubr.msk.f32.vlgmr.msra.gmra.mrb[0].mxu0 %vm60_vm1, %v55_v12  ;;  %1219 = vmatprep.subr.bf16.mxu1 %v1343_v0  ;;  %v1232_v57 = vpack.c.bf16 %v1023_v56, %v1022_v55  ;;  %v1029_v2 = vld [vmem:[%s1594_s2 + $0x40] sm:$0xff]  ;;  %v1241_v11 = vpack.c.bf16 %v1032_v10, %v1031_v8  ;;  %v1034_v17 = vld [vmem:[%s1595_s3 + $0x8] sm:$0xf]  ;;  %v828_v27 = vld [vmem:[#allocation5 + $0x50] sm:$0xff] }
  0x32   :  { %1122 = vmatprep.mubr.msk.f32.mxu0 %vm1344_vm0, %v1345_v1  ;;  %1215 = vmatpush3.bf16.msra.mxu0 %v1214_v19  ;;  %v1238_v4 = vpack.c.bf16 %v1030_v3, %v1029_v2  ;;  %v829_v29 = vld [vmem:[#allocation5 + $0x58] sm:$0xff] }
  0x33   :  { %1216 = vmatprep.subr.bf16.mxu0 %v1343_v0 }
  0x36   :  { %1218 = vmatpush3.bf16.msra.mxu0 %v1217_v30  ;;  %v1247_v30 = vpack.c.bf16 %v829_v29, %v828_v27 }
  0x37   :  { %1136 = vmatprep.subr.mxu0 %v1345_v1 }
  0x9b   :  { %v314_v54 = vpop.permute.xlu1 %313 }
  0x9e   :  { %v148_v33 = vpop.permute.xlu0 %147 }
  0xa2   :  { %v229_v39 = vpop.permute.xlu0 %228 }
 0x104   :  { %v1455_v22 = vpop.f32.mrb[0].mxu0 }
 0x105   :  { %v141_v23 = vadd.f32 %v1008_v16, %v1455_v22  ;;  %v1102_v24 = vpop.f32.mrb[1].mxu0  ;;  %v316_v59 = vadd.f32 %v314_v54, %v1455_v22 }
 0x107   :  { %v142_v26 = vmax.f32 %v141_v23, 0.0 }
 0x109   :  { %1112 = vmatmul.mubr.msk.f32.vlgmr.msra.gmra.mrb[0].mxu1 %vm60_vm1, %v142_v26  ;;  %v827_v26 = vld [vmem:[#allocation5 + $0x48] sm:$0xff] }
 0x10a   :  { %1221 = vmatpush3.bf16.msra.mxu1 %v1220_v25  ;;  %1133 = vmatprep.mubr.msk.f32.mxu1 %vm1344_vm0, %v1345_v1  ;;  %v826_v25 = vld [vmem:[#allocation5 + $0x40] sm:$0xff] }
 0x10b   :  { %1222 = vmatprep.subr.bf16.mxu1 %v1343_v0  ;;  %v1244_v28 = vpack.c.bf16 %v827_v26, %v826_v25 }
 0x10e   :  { %1224 = vmatpush3.bf16.msra.mxu1 %v1223_v32 }
 0x10f   :  { %1225 = vmatprep.subr.bf16.mxu1 %v1343_v0 }
 0x1dc   :  { %v219_v34 = vpop.f32.mrb[0].mxu1 }
 0x1dd   :  { %v220_v35 = vadd.f32 %v219_v34, %v148_v33  ;;  %v1113_v36 = vpop.f32.mrb[1].mxu1  ;;  %v1039_v33 = vld [vmem:[%s1597_s5 + $0x48] sm:$0xff] }
 0x1df   :  { %v223_v37 = vmax.f32 %v220_v35, 0.0 }
 0x1e1   :  { %1123 = vmatmul.mubr.msk.f32.vlgmr.msra.gmra.mrb[2].mxu0 %vm60_vm1, %v223_v37  ;;  %1134 = vmatmul.mubr.msk.f32.vlgmr.msra.gmra.mrb[2].mxu1 %vm60_vm1, %v223_v37 }
 0x1e2   :  { %1137 = vmatpush3.msk.msra.mxu0 %vm403_vm2, %v1018_v38  ;;  %1138 = vmatprep.mubr.msk.f32.mxu0 %vm1344_vm0, %v1345_v1 }
 0x1e3   :  { %1149 = vmatprep.mubr.msk.f32.mxu1 %vm1344_vm0, %v1345_v1  ;;  %1231 = vmatprep.subr.bf16.mxu0 %v1343_v0 }
 0x1e4   :  { %1227 = vmatpush3.bf16.msra.mxu1 %v1226_v48 }
 0x1e5   :  { %1228 = vmatprep.subr.bf16.mxu1 %v1343_v0 }
 0x1e8   :  { %1230 = vmatpush3.bf16.msra.mxu1 %v1229_v50 }
 0x1e9   :  { %1237 = vmatprep.subr.bf16.mxu1 %v1343_v0 }
 0x2b4   :  { %v300_v40 = vpop.f32.mrb[2].mxu0  ;;  %v388_v41 = vpop.f32.mrb[2].mxu1 }
 0x2b5   :  { %v301_v42 = vadd.f32 %v300_v40, %v229_v39  ;;  %393 = vrot.lane.b32.xlu1 %v388_v41, %s1346_s27  ;;  %v1124_v43 = vpop.f32.mrb[3].mxu0  ;;  %v1135_v44 = vpop.f32.mrb[3].mxu1 }
 0x2b6   :  { %v1040_v43 = vld [vmem:[%s1597_s5 + $0x50] sm:$0xff]  ;;  %v1041_v44 = vld [vmem:[%s1597_s5 + $0x58] sm:$0xff] }
 0x2b7   :  { %305 = vst.msk [vmem:[#allocation7] sm:$0x3] %vm304_vm3, %v301_v42  ;;  %1139 = vmatmul.mubr.msk.f32.vlgmr.msra.gmra.mrb[4].mxu0 %vm399_vm4, %v301_v42 }
 0x2b8   :  { %1160 = vmatprep.mubr.msk.f32.mxu0 %vm1344_vm0, %v1345_v1  ;;  %1233 = vmatpush3.bf16.msra.mxu0 %v1232_v57 }
 0x2b9   :  { %1234 = vmatprep.subr.bf16.mxu0 %v1343_v0 }
 0x327   :  { %v394_v58 = vpop.permute.xlu1 %393 }
 0x328   :  { %v396_v60 = vadd.f32 %v394_v58, %v316_v59 }
 0x38a   :  { %v473_v51 = vpop.f32.mrb[4].mxu0 }
 0x38b   :  { %478 = vrot.lane.b32.xlu0 %v473_v51, %s1346_s27  ;;  %v1140_v52 = vpop.f32.mrb[5].mxu0 }
 0x38f   :  { %491 = vrot.lane.b32.xlu0 %v1424_v7, %s1347_s12 }
 0x393   :  { %657 = vrot.lane.b32.xlu0 %v1501_v53, %s1348_s1 }
 0x3fd   :  { %v479_v61 = vpop.permute.xlu0 %478 }
 0x3fe   :  { %v481_v62 = vadd.f32 %v479_v61, %v396_v60 }
 0x400   :  { %v482_v63 = vmax.f32 %v481_v62, 0.0 }
 0x401   :  { %v492_v12 = vpop.permute.xlu0 %491 }
 0x402   :  { %489 = vrot.lane.b32.xlu1 %v482_v63, %s1347_s12 }
 0x405   :  { %v658_v35 = vpop.permute.xlu0 %657 }
 0x406   :  { %572 = vrot.lane.b32.xlu1 %v1424_v7, %s1348_s1  ;;  %v1025_v7 = vld [vmem:[%s1597_s5 + $0x38] sm:$0xff]  ;;  %v660_v37 = vadd.f32 %v658_v35, %v1455_v22 }
 0x407   :  { %v1235_v9 = vpack.c.bf16 %v1025_v7, %v1024_v6 }
 0x409   :  { %1236 = vmatpush3.bf16.msra.mxu0 %v1235_v9 }
 0x40a   :  { %1174 = vmatprep.subr.mxu0 %v1345_v1 }
 0x474   :  { %v490_v5 = vpop.permute.xlu1 %489 }
 0x475   :  { %1150 = vmatmul.mubr.msk.f32.vlgmr.msra.gmra.mrb[4].mxu1 %vm60_vm1, %v490_v5 }
 0x476   :  { %1239 = vmatpush3.bf16.msra.mxu1 %v1238_v4  ;;  %1171 = vmatprep.mubr.msk.f32.mxu1 %vm1344_vm0, %v1345_v1 }
 0x477   :  { %1240 = vmatprep.subr.bf16.mxu1 %v1343_v0 }
 0x478   :  { %v573_v18 = vpop.permute.xlu1 %572 }
 0x47a   :  { %1242 = vmatpush3.bf16.msra.mxu1 %v1241_v11 }
 0x47b   :  { %1249 = vmatprep.subr.bf16.mxu1 %v1343_v0 }
 0x548   :  { %v562_v13 = vpop.f32.mrb[4].mxu1 }
 0x549   :  { %v563_v14 = vadd.f32 %v562_v13, %v492_v12  ;;  %v1151_v15 = vpop.f32.mrb[5].mxu1 }
 0x54b   :  { %v566_v16 = vmax.f32 %v563_v14, 0.0 }
 0x54d   :  { %1161 = vmatmul.mubr.msk.f32.vlgmr.msra.gmra.mrb[6].mxu0 %vm60_vm1, %v566_v16  ;;  %1172 = vmatmul.mubr.msk.f32.vlgmr.msra.gmra.mrb[6].mxu1 %vm60_vm1, %v566_v16 }
 0x54e   :  { %1175 = vmatpush3.msk.msra.mxu0 %vm403_vm2, %v1034_v17  ;;  %1176 = vmatprep.mubr.msk.f32.mxu0 %vm1344_vm0, %v1345_v1 }
 0x54f   :  { %1243 = vmatprep.subr.bf16.mxu0 %v1343_v0  ;;  %1198 = vmatprep.mubr.msk.f32.mxu1 %vm1344_vm0, %v1345_v1 }
 0x620   :  { %v644_v19 = vpop.f32.mrb[6].mxu0  ;;  %v732_v20 = vpop.f32.mrb[6].mxu1 }
 0x621   :  { %v645_v21 = vadd.f32 %v644_v19, %v573_v18  ;;  %737 = vrot.lane.b32.xlu1 %v732_v20, %s1348_s1  ;;  %v1162_v23 = vpop.f32.mrb[7].mxu0  ;;  %v1173_v24 = vpop.f32.mrb[7].mxu1 }
 0x623   :  { %649 = vst.msk [vmem:[#allocation7 + $0x2] sm:$0x3] %vm304_vm3, %v645_v21  ;;  %1177 = vmatmul.mubr.msk.f32.vlgmr.msra.gmra.mrb[8].mxu0 %vm399_vm4, %v645_v21 }
 0x624   :  { %1187 = vmatprep.mubr.msk.f32.mxu0 %vm1344_vm0, %v1345_v1  ;;  %1245 = vmatpush3.bf16.msra.mxu0 %v1244_v28  ;;  %v1038_v1 = vld [vmem:[%s1597_s5 + $0x40] sm:$0xff] }
 0x625   :  { %1246 = vmatprep.subr.bf16.mxu0 %v1343_v0  ;;  %v1250_v34 = vpack.c.bf16 %v1039_v33, %v1038_v1 }
 0x627   :  { %1251 = vmatpush3.bf16.msra.mxu1 %v1250_v34 }
 0x628   :  { %1248 = vmatpush3.bf16.msra.mxu0 %v1247_v30  ;;  %1252 = vmatprep.subr.bf16.mxu1 %v1343_v0  ;;  %v1253_v0 = vpack.c.bf16 %v1041_v44, %v1040_v43 }
 0x62b   :  { %1254 = vmatpush3.bf16.msra.mxu1 %v1253_v0 }
 0x693   :  { %v738_v36 = vpop.permute.xlu1 %737 }
 0x694   :  { %v740_v38 = vadd.f32 %v738_v36, %v660_v37 }
 0x6f6   :  { %v815_v31 = vpop.f32.mrb[8].mxu0 }
 0x6f7   :  { %820 = vrot.lane.b32.xlu0 %v815_v31, %s1348_s1  ;;  %v1178_v32 = vpop.f32.mrb[9].mxu0 }
 0x6fb   :  { %833 = vrot.lane.b32.xlu0 %v1501_v53, %s1347_s12 }
 0x769   :  { %v821_v39 = vpop.permute.xlu0 %820 }
 0x76a   :  { %v823_v40 = vadd.f32 %v821_v39, %v740_v38 }
 0x76c   :  { %v824_v41 = vmax.f32 %v823_v40, 0.0 }
 0x76d   :  { %v834_v22 = vpop.permute.xlu0 %833 }
 0x76e   :  { %831 = vrot.lane.b32.xlu1 %v824_v41, %s1348_s1  ;;  %s1349_s1 = smov [#allocation7]  }
 0x76f   :  { %s994_s28 = sshll.u32 %s1349_s1, 4  ;;  %s995_s28 = int_to_ptr.vmem [resolvable:$true] %s994_s28 }
 0x770   :  { %s1311_s29 = scalar_lea.vmem %s995_s28, 96  ;;  %p1316_p3 = scmp.lt.s32.totalorder %s995_s28, %s995_s28 }
 0x771   :  { %p1312_p2 = scmp.ne.s32.totalorder %s995_s28, %s1311_s29  ;;  %p1317_p4 = scmp.lt.s32.totalorder %s1311_s29, %s1311_s29 }
 0x773   :  { %p1318_p5 = por %p1317_p4, %p1316_p3 }
 0x775   :  { %p1319_p6 = pnand %p1318_p5, %p1312_p2 }
 0x7e0   :  { %v832_v42 = vpop.permute.xlu1 %831 }
 0x7e1   :  { %1188 = vmatmul.mubr.msk.f32.vlgmr.msra.gmra.mrb[10].mxu0 %vm60_vm1, %v832_v42 }
 0x8b4   :  { %v904_v45 = vpop.f32.mrb[10].mxu0 }
 0x8b5   :  { %v905_v46 = vadd.f32 %v904_v45, %v834_v22  ;;  %v1189_v47 = vpop.f32.mrb[11].mxu0 }
 0x8b7   :  { %v908_v48 = vmax.f32 %v905_v46, 0.0 }
 0x8b9   :  { %1199 = vmatmul.mubr.msk.f32.vlgmr.msra.gmra.mrb[8].mxu1 %vm60_vm1, %v908_v48 }
 0x98c   :  { %v983_v49 = vpop.f32.mrb[8].mxu1 }
 0x98d   :  { %v984_v50 = vadd.f32 %v983_v49, %v658_v35  ;;  %v1200_v51 = vpop.f32.mrb[9].mxu1 }
 0x98f   :  { %988 = vst.msk [vmem:[#allocation7 + $0x4] sm:$0x3] %vm304_vm3, %v984_v50 }
 0x990   :  { %1322 = shalt.err (!%p1319_p6)
}
 0x991   :  { %s1323_s8 = scalar_lea.hbm %s1599_s7, 96 }
 0x992   :  { %p1324_p7 = scmp.ne.s32.totalorder %s1599_s7, %s1323_s8  ;;  %p1327_p8 = scmp.lt.u32.totalorder %s1323_s8, %s1599_s7 }
 0x994   :  { %p1329_p9 = pnand %p1327_p8, %p1324_p7 }
 0x996   :  { %1332 = shalt.err (!%p1329_p9)
}
 0x997   :  { %s1350_s11 = smov 2  }
 0x998   :  { %1000 = dma.vmem_to_hbm [thread:$0]  %s995_s28, 96, %s1599_s7, [#allocation4], %s1346_s27, %s1346_s27, %s1350_s11  }
 0x999   :  { %1337 = dma.done.wait [#allocation4], 96  }
 0x99a   :  { %1338 = vsyncadd [#allocation4], 4294967200 }
 0x99b   :  { %1004 = vsyncpa [#allocation3], 1 }
 0x99c   :  { %1005 = vsyncpa [#allocation6], 1 }
 0x99d   :  { %1006 = vsyncpa [#allocation4], 1 }

</bundles_post_ra>
